<compile_context>
chip_gen: v7x
topology: tpu7x:2x2x1
jax: 0.10.0
libtpu: 0.0.40
codegen_flags: <defaults>
</compile_context>

<pallas_src>
import functools

import jax
import jax.numpy as jnp
from jax.experimental import pallas as pl
from jax.experimental.pallas import tpu as pltpu


# ----------------------------------------------------------------------------
# Kernels: fused 3-layer MLP (Linear -> ReLU -> Linear -> ReLU -> Linear)
# ----------------------------------------------------------------------------
def _critic_v_kernel(obs_ref, w1_ref, b1_ref, w2_ref, b2_ref, w3_ref, b3_ref,
                     out_ref):
    x = obs_ref[...]                                                # [Tb, Dobs]
    h1 = jnp.dot(x, w1_ref[...], preferred_element_type=jnp.float32) + b1_ref[...]
    h1 = jnp.maximum(h1, 0.0)
    h2 = jnp.dot(h1, w2_ref[...], preferred_element_type=jnp.float32) + b2_ref[...]
    h2 = jnp.maximum(h2, 0.0)
    # Final N=1 layer: VPU multiply + lane reduce instead of an MXU matmul.
    v = jnp.sum(h2 * w3_ref[...], axis=-1, keepdims=True) + b3_ref[...]
    out_ref[...] = v.astype(out_ref.dtype)                          # [Tb, 1]


def _critic_q_kernel(obs_ref, act_ref, w1o_ref, w1a_ref, b1_ref, w2_ref,
                     b2_ref, w3_ref, b3_ref, out_ref):
    # First layer split so obs/act never need to be concatenated in HBM.
    h1 = (jnp.dot(obs_ref[...], w1o_ref[...], preferred_element_type=jnp.float32)
          + jnp.dot(act_ref[...], w1a_ref[...], preferred_element_type=jnp.float32)
          + b1_ref[...])
    h1 = jnp.maximum(h1, 0.0)
    h2 = jnp.dot(h1, w2_ref[...], preferred_element_type=jnp.float32) + b2_ref[...]
    h2 = jnp.maximum(h2, 0.0)
    v = jnp.sum(h2 * w3_ref[...], axis=-1, keepdims=True) + b3_ref[...]
    out_ref[...] = v.astype(out_ref.dtype)


# ----------------------------------------------------------------------------
# pallas_call wrappers
# ----------------------------------------------------------------------------
_MAX_TILE_B = 512  # per-step overhead ~0.35us -> big tiles; tiny vs VMEM here.


def _choose_tile(batch):
    if batch <= _MAX_TILE_B:
        return max(8, -(-batch // 8) * 8)      # round up to sublane multiple
    return _MAX_TILE_B


def _resident_spec(arr):
    # Full-array block, same block for every grid step -> stays VMEM-resident.
    return pl.BlockSpec(arr.shape, lambda i: (0, 0))


def _batched_spec(tile, feat):
    return pl.BlockSpec((tile, feat), lambda i: (i, 0))


def _run_v(obs, w1, b1, w2, b2, w3, b3, tile):
    bp, dobs = obs.shape
    h1, h2 = w1.shape[1], w2.shape[1]
    flops = 2 * bp * (dobs * h1 + h1 * h2 + h2)
    bytes_accessed = 4 * (bp * dobs + dobs * h1 + h1 + h1 * h2 + h2 + h2 + 1 + bp)
    return pl.pallas_call(
        _critic_v_kernel,
        out_shape=jax.ShapeDtypeStruct((bp, 1), jnp.float32),
        grid=(bp // tile,),
        in_specs=[
            _batched_spec(tile, dobs),
            _resident_spec(w1), _resident_spec(b1),
            _resident_spec(w2), _resident_spec(b2),
            _resident_spec(w3), _resident_spec(b3),
        ],
        out_specs=_batched_spec(tile, 1),
        compiler_params=pltpu.CompilerParams(dimension_semantics=("parallel",)),
        cost_estimate=pl.CostEstimate(flops=flops, transcendentals=0,
                                      bytes_accessed=bytes_accessed),
    )(obs, w1, b1, w2, b2, w3, b3)


def _run_q(obs, act, w1o, w1a, b1, w2, b2, w3, b3, tile):
    bp, dobs = obs.shape
    dact = act.shape[1]
    h1, h2 = w1o.shape[1], w2.shape[1]
    flops = 2 * bp * ((dobs + dact) * h1 + h1 * h2 + h2)
    bytes_accessed = 4 * (bp * (dobs + dact) + (dobs + dact) * h1 + h1
                          + h1 * h2 + h2 + h2 + 1 + bp)
    return pl.pallas_call(
        _critic_q_kernel,
        out_shape=jax.ShapeDtypeStruct((bp, 1), jnp.float32),
        grid=(bp // tile,),
        in_specs=[
            _batched_spec(tile, dobs),
            _batched_spec(tile, dact),
            _resident_spec(w1o), _resident_spec(w1a), _resident_spec(b1),
            _resident_spec(w2), _resident_spec(b2),
            _resident_spec(w3), _resident_spec(b3),
        ],
        out_specs=_batched_spec(tile, 1),
        compiler_params=pltpu.CompilerParams(dimension_semantics=("parallel",)),
        cost_estimate=pl.CostEstimate(flops=flops, transcendentals=0,
                                      bytes_accessed=bytes_accessed),
    )(obs, act, w1o, w1a, b1, w2, b2, w3, b3)


@functools.partial(jax.jit, static_argnames=())
def critic_forward(params, obs, act=None):
    """If act is not None -> Q(obs, act); else -> V(obs). Returns [B, 1] f32."""
    obs = obs.astype(jnp.float32)
    batch = obs.shape[0]
    tile = _choose_tile(batch)
    bp = -(-batch // tile) * tile
    pad_rows = bp - batch
    obs_p = jnp.pad(obs, ((0, pad_rows), (0, 0))) if pad_rows else obs

    if act is None:
        out = _run_v(obs_p, params['w1_obs'], params['b1'], params['w2'],
                     params['b2'], params['w3_row'], params['b3'], tile)
    else:
        act = act.astype(jnp.float32)
        act_p = jnp.pad(act, ((0, pad_rows), (0, 0))) if pad_rows else act
        out = _run_q(obs_p, act_p, params['w1_obs'], params['w1_act'],
                     params['b1'], params['w2'], params['b2'],
                     params['w3_row'], params['b3'], tile)
    return out[:batch]


# ----------------------------------------------------------------------------
# Parameter init (xavier_uniform weights, zero biases) — deterministic
# ----------------------------------------------------------------------------
def _xavier_uniform(key, fan_in, fan_out):
    limit = jnp.sqrt(6.0 / (fan_in + fan_out))
    return jax.random.uniform(key, (fan_in, fan_out), jnp.float32, -limit, limit)


def init_critic_params(key, obs_dim, act_dim, hidden_sizes):
    """act_dim=0 -> V critic params; act_dim>0 -> Q critic params."""
    h1, h2 = hidden_sizes
    in_dim = obs_dim + act_dim
    k1, k2, k3 = jax.random.split(key, 3)
    w1 = _xavier_uniform(k1, in_dim, h1)
    params = {
        'w1_obs': w1[:obs_dim],
        'w1_act': w1[obs_dim:] if act_dim > 0 else None,
        'b1': jnp.zeros((1, h1), jnp.float32),
        'w2': _xavier_uniform(k2, h1, h2),
        'b2': jnp.zeros((1, h2), jnp.float32),
        # final layer stored as a [1, h2] row for the VPU mul + lane reduce
        'w3_row': _xavier_uniform(k3, h2, 1).T,
        'b3': jnp.zeros((1, 1), jnp.float32),
    }
    return params


# ----------------------------------------------------------------------------
# Pure-JAX reference for correctness checking.
# ----------------------------------------------------------------------------
def critic_forward_ref(params, obs, act=None):
    if act is None:
        x = obs
        w1 = params['w1_obs']
    else:
        x = jnp.concatenate([obs, act], axis=-1)
        w1 = jnp.concatenate([params['w1_obs'], params['w1_act']], axis=0)
    h = jnp.maximum(x @ w1 + params['b1'], 0.0)
    h = jnp.maximum(h @ params['w2'] + params['b2'], 0.0)
    return h @ params['w3_row'].T + params['b3']


if __name__ == "__main__":
    key = jax.random.PRNGKey(0)
    k_obs, k_act, k_q, k_v, k_big = jax.random.split(key, 5)

    batch, obs_dim, act_dim = 2, 16, 8
    hidden_sizes = [32, 32]

    obs = jax.random.normal(k_obs, (batch, obs_dim), jnp.float32)
    act = jax.random.normal(k_act, (batch, act_dim), jnp.float32)

    # Q-critic: input = obs + act
    q_params = init_critic_params(k_q, obs_dim, act_dim, hidden_sizes)
    q_val = jax.block_until_ready(critic_forward(q_params, obs, act))

    # V-critic: input = obs only
    v_params = init_critic_params(k_v, obs_dim, 0, hidden_sizes)
    v_val = jax.block_until_ready(critic_forward(v_params, obs))

    # Verify against pure-JAX reference.
    q_ref = critic_forward_ref(q_params, obs, act)
    v_ref = critic_forward_ref(v_params, obs)
    assert q_val.shape == (batch, 1) and v_val.shape == (batch, 1)
    assert jnp.allclose(q_val, q_ref, atol=1e-5), "Q-critic mismatch"
    assert jnp.allclose(v_val, v_ref, atol=1e-5), "V-critic mismatch"

    # Multi-tile + ragged-batch check (exercises the batch grid and padding).
    big_b = 600
    big_obs = jax.random.normal(k_big, (big_b, obs_dim), jnp.float32)
    big_act = jax.random.normal(k_big, (big_b, act_dim), jnp.float32)
    big_val = jax.block_until_ready(critic_forward(q_params, big_obs, big_act))
    big_ref = critic_forward_ref(q_params, big_obs, big_act)
    assert big_val.shape == (big_b, 1)
    assert jnp.allclose(big_val, big_ref, atol=1e-4), "big-batch Q-critic mismatch"

    print("KERNEL_OK")
</pallas_src>

<mosaic_0001>
module attributes {stable_mosaic.version = 11 : i64} {
  func.func @_critic_q_kernel(%arg0: i32, %arg1: memref<8x16xf32, #tpu.memory_space<vmem>>, %arg2: memref<8x8xf32, #tpu.memory_space<vmem>>, %arg3: memref<16x32xf32, #tpu.memory_space<vmem>>, %arg4: memref<8x32xf32, #tpu.memory_space<vmem>>, %arg5: memref<1x32xf32, #tpu.memory_space<vmem>>, %arg6: memref<32x32xf32, #tpu.memory_space<vmem>>, %arg7: memref<1x32xf32, #tpu.memory_space<vmem>>, %arg8: memref<1x32xf32, #tpu.memory_space<vmem>>, %arg9: memref<1x1xf32, #tpu.memory_space<vmem>>, %arg10: memref<8x1xf32, #tpu.memory_space<vmem>>) attributes {dimension_semantics = [#tpu.dimension_semantics<parallel>], iteration_bounds = array<i64: 1>, scalar_prefetch = 0 : i64, scratch_operands = 0 : i64, tpu.core_type = #tpu.core_type<tc>, window_params = [{transform_indices = @transform_0, window_bounds = array<i64: 8, 16>}, {transform_indices = @transform_1, window_bounds = array<i64: 8, 8>}, {pipeline_mode = #tpu.pipeline_mode<synchronous>, transform_indices = @transform_2, window_bounds = array<i64: 16, 32>}, {pipeline_mode = #tpu.pipeline_mode<synchronous>, transform_indices = @transform_3, window_bounds = array<i64: 8, 32>}, {pipeline_mode = #tpu.pipeline_mode<synchronous>, transform_indices = @transform_4, window_bounds = array<i64: 1, 32>}, {pipeline_mode = #tpu.pipeline_mode<synchronous>, transform_indices = @transform_5, window_bounds = array<i64: 32, 32>}, {pipeline_mode = #tpu.pipeline_mode<synchronous>, transform_indices = @transform_6, window_bounds = array<i64: 1, 32>}, {pipeline_mode = #tpu.pipeline_mode<synchronous>, transform_indices = @transform_7, window_bounds = array<i64: 1, 32>}, {pipeline_mode = #tpu.pipeline_mode<synchronous>, transform_indices = @transform_8, window_bounds = array<i64: 1, 1>}, {transform_indices = @transform_9, window_bounds = array<i64: 8, 1>}]} {
    %c0 = arith.constant 0 : index
    %c0_0 = arith.constant 0 : index
    %0 = vector.load %arg1[%c0, %c0_0] : memref<8x16xf32, #tpu.memory_space<vmem>>, vector<8x16xf32>
    %c0_1 = arith.constant 0 : index
    %c0_2 = arith.constant 0 : index
    %1 = vector.load %arg3[%c0_1, %c0_2] : memref<16x32xf32, #tpu.memory_space<vmem>>, vector<16x32xf32>
    %cst = arith.constant dense<0.000000e+00> : vector<8x32xf32>
    %2 = tpu.matmul %0, %1, %cst {dimension_numbers = #tpu.dot_dimension_numbers<[1], [0], [0], [1], [0, 0, 1, 1], [], []>} : vector<8x16xf32>, vector<16x32xf32>, vector<8x32xf32> -> vector<8x32xf32>
    %c0_3 = arith.constant 0 : index
    %c0_4 = arith.constant 0 : index
    %3 = vector.load %arg2[%c0_3, %c0_4] : memref<8x8xf32, #tpu.memory_space<vmem>>, vector<8x8xf32>
    %c0_5 = arith.constant 0 : index
    %c0_6 = arith.constant 0 : index
    %4 = vector.load %arg4[%c0_5, %c0_6] : memref<8x32xf32, #tpu.memory_space<vmem>>, vector<8x32xf32>
    %cst_7 = arith.constant dense<0.000000e+00> : vector<8x32xf32>
    %5 = tpu.matmul %3, %4, %cst_7 {dimension_numbers = #tpu.dot_dimension_numbers<[1], [0], [0], [1], [0, 0, 1, 1], [], []>} : vector<8x8xf32>, vector<8x32xf32>, vector<8x32xf32> -> vector<8x32xf32>
    %6 = arith.addf %2, %5 : vector<8x32xf32>
    %c0_8 = arith.constant 0 : index
    %c0_9 = arith.constant 0 : index
    %7 = vector.load %arg5[%c0_8, %c0_9] : memref<1x32xf32, #tpu.memory_space<vmem>>, vector<1x32xf32>
    %8 = vector.broadcast %7 : vector<1x32xf32> to vector<8x32xf32>
    %9 = arith.addf %6, %8 : vector<8x32xf32>
    %cst_10 = arith.constant 0.000000e+00 : f32
    %10 = vector.broadcast %cst_10 : f32 to vector<8x32xf32>
    %11 = arith.maximumf %9, %10 : vector<8x32xf32>
    %c0_11 = arith.constant 0 : index
    %c0_12 = arith.constant 0 : index
    %12 = vector.load %arg6[%c0_11, %c0_12] : memref<32x32xf32, #tpu.memory_space<vmem>>, vector<32x32xf32>
    %cst_13 = arith.constant dense<0.000000e+00> : vector<8x32xf32>
    %13 = tpu.matmul %11, %12, %cst_13 {dimension_numbers = #tpu.dot_dimension_numbers<[1], [0], [0], [1], [0, 0, 1, 1], [], []>} : vector<8x32xf32>, vector<32x32xf32>, vector<8x32xf32> -> vector<8x32xf32>
    %c0_14 = arith.constant 0 : index
    %c0_15 = arith.constant 0 : index
    %14 = vector.load %arg7[%c0_14, %c0_15] : memref<1x32xf32, #tpu.memory_space<vmem>>, vector<1x32xf32>
    %15 = vector.broadcast %14 : vector<1x32xf32> to vector<8x32xf32>
    %16 = arith.addf %13, %15 : vector<8x32xf32>
    %cst_16 = arith.constant 0.000000e+00 : f32
    %17 = vector.broadcast %cst_16 : f32 to vector<8x32xf32>
    %18 = arith.maximumf %16, %17 : vector<8x32xf32>
    %c0_17 = arith.constant 0 : index
    %c0_18 = arith.constant 0 : index
    %19 = vector.load %arg8[%c0_17, %c0_18] : memref<1x32xf32, #tpu.memory_space<vmem>>, vector<1x32xf32>
    %20 = vector.broadcast %19 : vector<1x32xf32> to vector<8x32xf32>
    %21 = arith.mulf %18, %20 : vector<8x32xf32>
    %cst_19 = arith.constant dense<0.000000e+00> : vector<8xf32>
    %22 = vector.multi_reduction <add>, %21, %cst_19 [1] : vector<8x32xf32> to vector<8xf32>
    %23 = vector.shape_cast %22 : vector<8xf32> to vector<8x1xf32>
    %c0_20 = arith.constant 0 : index
    %c0_21 = arith.constant 0 : index
    %24 = vector.load %arg9[%c0_20, %c0_21] : memref<1x1xf32, #tpu.memory_space<vmem>>, vector<1x1xf32>
    %25 = vector.broadcast %24 : vector<1x1xf32> to vector<8x1xf32>
    %26 = arith.addf %23, %25 : vector<8x1xf32>
    %c0_22 = arith.constant 0 : index
    %c0_23 = arith.constant 0 : index
    %27 = vector.load %arg10[%c0_22, %c0_23] : memref<8x1xf32, #tpu.memory_space<vmem>>, vector<8x1xf32>
    tpu.vector_store %arg10[%c0_22, %c0_23], %26 {strides = array<i32>} : memref<8x1xf32, #tpu.memory_space<vmem>>, vector<8x1xf32>,
    return
  }
  func.func @transform_0(%arg0: i32) -> (i32, i32) {
    %c0_i32 = arith.constant 0 : i32
    %c0_i32_0 = arith.constant 0 : i32
    return %arg0, %c0_i32 : i32, i32
  }
  func.func @transform_1(%arg0: i32) -> (i32, i32) {
    %c0_i32 = arith.constant 0 : i32
    %c0_i32_0 = arith.constant 0 : i32
    return %arg0, %c0_i32 : i32, i32
  }
  func.func @transform_2(%arg0: i32) -> (i32, i32) {
    %c0_i32 = arith.constant 0 : i32
    %c0_i32_0 = arith.constant 0 : i32
    %c0_i32_1 = arith.constant 0 : i32
    return %c0_i32, %c0_i32_0 : i32, i32
  }
  func.func @transform_3(%arg0: i32) -> (i32, i32) {
    %c0_i32 = arith.constant 0 : i32
    %c0_i32_0 = arith.constant 0 : i32
    %c0_i32_1 = arith.constant 0 : i32
    return %c0_i32, %c0_i32_0 : i32, i32
  }
  func.func @transform_4(%arg0: i32) -> (i32, i32) {
    %c0_i32 = arith.constant 0 : i32
    %c0_i32_0 = arith.constant 0 : i32
    %c0_i32_1 = arith.constant 0 : i32
    return %c0_i32, %c0_i32_0 : i32, i32
  }
  func.func @transform_5(%arg0: i32) -> (i32, i32) {
    %c0_i32 = arith.constant 0 : i32
    %c0_i32_0 = arith.constant 0 : i32
    %c0_i32_1 = arith.constant 0 : i32
    return %c0_i32, %c0_i32_0 : i32, i32
  }
  func.func @transform_6(%arg0: i32) -> (i32, i32) {
    %c0_i32 = arith.constant 0 : i32
    %c0_i32_0 = arith.constant 0 : i32
    %c0_i32_1 = arith.constant 0 : i32
    return %c0_i32, %c0_i32_0 : i32, i32
  }
  func.func @transform_7(%arg0: i32) -> (i32, i32) {
    %c0_i32 = arith.constant 0 : i32
    %c0_i32_0 = arith.constant 0 : i32
    %c0_i32_1 = arith.constant 0 : i32
    return %c0_i32, %c0_i32_0 : i32, i32
  }
  func.func @transform_8(%arg0: i32) -> (i32, i32) {
    %c0_i32 = arith.constant 0 : i32
    %c0_i32_0 = arith.constant 0 : i32
    %c0_i32_1 = arith.constant 0 : i32
    return %c0_i32, %c0_i32_0 : i32, i32
  }
  func.func @transform_9(%arg0: i32) -> (i32, i32) {
    %c0_i32 = arith.constant 0 : i32
    %c0_i32_0 = arith.constant 0 : i32
    return %arg0, %c0_i32 : i32, i32
  }
}

</mosaic_0001>

<bundles_post_ra>
// kernel: critic_forward.1
= control target key start
LH: loop header
LB: loop body
LE: loop exit
PB: predicated region body
PF: predicated region fallthrough
CT: control target
= control target key end

     0   :  { %s652_s0 = inlined_call_operand.vmem [shape: f32[8,16], index: 0, kind: input, shape index: {}]   ;;  %s653_s1 = inlined_call_operand.vmem [shape: f32[8,8], index: 1, kind: input, shape index: {}]   ;;  %s654_s2 = inlined_call_operand.hbm [shape: f32[16,32], index: 2, kind: input, shape index: {}]   ;;  %s655_s3 = inlined_call_operand.vmem [shape: f32[8,32], index: 3, kind: input, shape index: {}]   ;;  %s656_s4 = inlined_call_operand.hbm [shape: f32[1,32], index: 4, kind: input, shape index: {}]   ;;  %s657_s5 = inlined_call_operand.vmem [shape: f32[32,32], index: 5, kind: input, shape index: {}]   ;;  %s658_s6 = inlined_call_operand.hbm [shape: f32[1,32], index: 6, kind: input, shape index: {}]   ;;  %s659_s7 = inlined_call_operand.hbm [shape: f32[1,32], index: 7, kind: input, shape index: {}]   ;;  %s660_s8 = inlined_call_operand.<no memory space> [shape: f32[1,1], index: 8, kind: input, shape index: {}]   ;;  %s661_s9 = inlined_call_operand.vmem [shape: f32[8,1], index: 9, kind: output, shape index: {}]  }
   0x1   :  { %v14_v0 = vstv %s660_s8 }
   0x2   :  { %15 = vst [vmem:[#allocation2] sm:$0x1] %v14_v0 }
   0x3   :  { %16 = vsyncpa [#allocation4], 0 }
   0x4   :  { %17 = vsyncpa [#allocation6], 0 }
   0x5   :  { %18 = vsyncpa [#allocation9], 0  ;;  %s511_s11 = smov [#allocation5]   ;;  %s512_s13 = smov [#allocation3]  }
   0x6   :  { %s43_s12 = sshll.u32 %s511_s11, 4  ;;  %s28_s14 = sshll.u32 %s512_s13, 4  ;;  %s44_s12 = int_to_ptr.vmem [resolvable:$true] %s43_s12  ;;  %s573_s14 = int_to_ptr.vmem [resolvable:$true] %s28_s14 }
   0x7   :  { %s417_s17 = scalar_lea.hbm %s656_s4, 16 }
   0x8   :  { %p418_p0 = scmp.ne.s32.totalorder %s656_s4, %s417_s17  ;;  %p421_p1 = scmp.lt.u32.totalorder %s417_s17, %s656_s4 }
   0xa   :  { %p423_p2 = pnand %p421_p1, %p418_p0 }
   0xc   :  { %426 = shalt.err (!%p423_p2)
}
   0xd   :  { %s427_s21 = scalar_lea.vmem %s44_s12, 16  ;;  %s431_s22 = scalar_lea.vmem %s44_s12, 32 }
   0xe   :  { %p428_p3 = scmp.ne.s32.totalorder %s44_s12, %s427_s21  ;;  %p432_p4 = scmp.lt.s32.totalorder %s44_s12, %s44_s12 }
   0xf   :  { %p433_p5 = scmp.lt.s32.totalorder %s431_s22, %s427_s21 }
  0x11   :  { %p434_p6 = por %p433_p5, %p432_p4 }
  0x13   :  { %p435_p7 = pnand %p434_p6, %p428_p3 }
  0x15   :  { %438 = shalt.err (!%p435_p7)
}
  0x16   :  { %46 = dma.hbm_to_vmem [thread:$0]  %s656_s4, 16, %s44_s12, [#allocation6]  }
  0x17   :  { %s439_s27 = scalar_lea.hbm %s654_s2, 256 }
  0x18   :  { %p440_p8 = scmp.ne.s32.totalorder %s654_s2, %s439_s27  ;;  %p443_p9 = scmp.lt.u32.totalorder %s439_s27, %s654_s2 }
  0x1a   :  { %p445_p10 = pnand %p443_p9, %p440_p8 }
  0x1c   :  { %448 = shalt.err (!%p445_p10)
}
  0x1d   :  { %s449_s11 = scalar_lea.vmem %s573_s14, 256  ;;  %p454_p12 = scmp.lt.s32.totalorder %s573_s14, %s573_s14 }
  0x1e   :  { %p450_p11 = scmp.ne.s32.totalorder %s573_s14, %s449_s11  ;;  %p455_p13 = scmp.lt.s32.totalorder %s449_s11, %s449_s11 }
  0x20   :  { %p456_p0 = por %p455_p13, %p454_p12 }
  0x22   :  { %p457_p1 = pnand %p456_p0, %p450_p11 }
  0x24   :  { %460 = shalt.err (!%p457_p1)
}
  0x25   :  { %s513_s4 = smov 128   ;;  %s514_s12 = smov 8  }
  0x26   :  { %34 = dma.hbm_to_vmem [thread:$0]  %s654_s2, 256, %s573_s14, [#allocation4], %s513_s4, %s513_s4, %s514_s12  }
  0x27   :  { %s515_s16 = smov [#allocation7]   ;;  %s516_s18 = smov [#allocation8]  }
  0x28   :  { %s55_s17 = sshll.u32 %s515_s16, 4  ;;  %s65_s19 = sshll.u32 %s516_s18, 4  ;;  %s56_s17 = int_to_ptr.vmem [resolvable:$true] %s55_s17  ;;  %s66_s19 = int_to_ptr.vmem [resolvable:$true] %s65_s19 }
  0x29   :  { %s461_s21 = scalar_lea.hbm %s658_s6, 16 }
  0x2a   :  { %p462_p2 = scmp.ne.s32.totalorder %s658_s6, %s461_s21  ;;  %p465_p3 = scmp.lt.u32.totalorder %s461_s21, %s658_s6 }
  0x2c   :  { %p467_p4 = pnand %p465_p3, %p462_p2 }
  0x2e   :  { %470 = shalt.err (!%p467_p4)
}
  0x2f   :  { %s471_s2 = scalar_lea.vmem %s56_s17, 16  ;;  %s475_s14 = scalar_lea.vmem %s56_s17, 32 }
  0x30   :  { %p472_p5 = scmp.ne.s32.totalorder %s56_s17, %s471_s2  ;;  %p476_p6 = scmp.lt.s32.totalorder %s56_s17, %s56_s17 }
  0x31   :  { %p477_p7 = scmp.lt.s32.totalorder %s475_s14, %s471_s2 }
  0x33   :  { %p478_p8 = por %p477_p7, %p476_p6 }
  0x35   :  { %p479_p9 = pnand %p478_p8, %p472_p5 }
  0x37   :  { %482 = shalt.err (!%p479_p9)
}
  0x38   :  { %58 = dma.hbm_to_vmem [thread:$0]  %s658_s6, 16, %s56_s17, [#allocation6]  }
  0x39   :  { %s483_s30 = scalar_lea.hbm %s659_s7, 16 }
  0x3a   :  { %p484_p10 = scmp.ne.s32.totalorder %s659_s7, %s483_s30  ;;  %p487_p11 = scmp.lt.u32.totalorder %s483_s30, %s659_s7 }
  0x3c   :  { %p489_p12 = pnand %p487_p11, %p484_p10 }
  0x3e   :  { %492 = shalt.err (!%p489_p12)
}
  0x3f   :  { %s493_s13 = scalar_lea.vmem %s66_s19, 16  ;;  %s497_s15 = scalar_lea.vmem %s66_s19, 32 }
  0x40   :  { %p494_p13 = scmp.ne.s32.totalorder %s66_s19, %s493_s13  ;;  %p498_p0 = scmp.lt.s32.totalorder %s66_s19, %s66_s19 }
  0x41   :  { %p499_p1 = scmp.lt.s32.totalorder %s497_s15, %s493_s13 }
  0x43   :  { %p500_p2 = por %p499_p1, %p498_p0 }
  0x45   :  { %p501_p3 = pnand %p500_p2, %p494_p13 }
  0x47   :  { %504 = shalt.err (!%p501_p3)
}
  0x48   :  { %68 = dma.hbm_to_vmem [thread:$0]  %s659_s7, 16, %s66_s19, [#allocation9]  }
  0x49   :  { %505 = dma.done.wait [#allocation4], 256  }
  0x4a   :  { %506 = vsyncadd [#allocation4], 4294967040 }
  0x4b   :  { %507 = dma.done.wait [#allocation6], 32  }
  0x4c   :  { %508 = vsyncadd [#allocation6], 4294967264 }
  0x4d   :  { %509 = dma.done.wait [#allocation9], 16  }
  0x4e   :  { %510 = vsyncadd [#allocation9], 4294967280  ;;  %v517_v1 = vmov 0.0   ;;  %vm518_vm0 = vmmov 0   ;;  %v519_v2 = vmov 0.0|0.0   ;;  %vm88_vm1 = vcmask 64512  }
  0x4f   :  { %376 = vmatprep.subr.mxu1 %v517_v1  ;;  %378 = vmatprep.mubr.msk.f32.mxu1 %vm518_vm0, %v517_v1  ;;  %v87_v3 = vld [vmem:[%s655_s3] sm:$0xff]  ;;  %v85_v6 = vld [vmem:[#allocation3 + $0x8] sm:$0xff]  ;;  %vm162_vm2 = vcmask 130048   ;;  %v248_v13 = vld [vmem:[%s657_s5 + $0x18] sm:$0xff]  ;;  %vm256_vm3 = vcmask 261120   ;;  %vm350_vm4 = vcmask 7168  }
  0x50   :  { %402 = vmatprep.subr.bf16.mxu0 %v519_v2  ;;  %396 = vmatprep.mubr.msk.f32.mxu0 %vm518_vm0, %v517_v1  ;;  %v86_v4 = vld [vmem:[%s653_s1] sm:$0xff]  ;;  %v246_v10 = vld [vmem:[%s657_s5 + $0x8] sm:$0xff]  ;;  %v247_v12 = vld [vmem:[%s657_s5 + $0x10] sm:$0xff] }
  0x51   :  { %v84_v5 = vld [vmem:[#allocation3] sm:$0xff]  ;;  %377 = vmatpush3.msra.mxu1 %v87_v3  ;;  %v406_v14 = vpack.c.bf16 %v248_v13, %v247_v12  ;;  %v361_v18 = vld [vmem:[#allocation5] ss:$0 sm:$0xff]  ;;  %v362_v23 = vld [vmem:[#allocation7] ss:$0 sm:$0xff] }
  0x52   :  { %379 = vmatmul.mubr.msk.f32.vlgmr.msra.gmra.mrb[0].mxu1 %vm88_vm1, %v86_v4  ;;  %399 = vmatprep.subr.bf16.mxu1 %v519_v2  ;;  %v400_v7 = vpack.c.bf16 %v85_v6, %v84_v5  ;;  %v83_v8 = vld [vmem:[%s652_s0] sm:$0xff]  ;;  %v364_v27 = vld [vmem:[#allocation8] ss:$0 sm:$0xff] }
  0x53   :  { %385 = vmatprep.mubr.msk.f32.mxu1 %vm518_vm0, %v517_v1  ;;  %v245_v9 = vld [vmem:[%s657_s5] sm:$0xff] }
  0x54   :  { %401 = vmatpush3.bf16.msra.mxu1 %v400_v7  ;;  %v403_v11 = vpack.c.bf16 %v246_v10, %v245_v9  ;;  %v365_v31 = vld [vmem:[#allocation2] ss:$0 sm:$0xff] }
  0x56   :  { %404 = vmatpush3.bf16.msra.mxu0 %v403_v11 }
  0x57   :  { %386 = vmatmul.mubr.msk.f32.vlgmr.msra.gmra.mrb[2].mxu1 %vm162_vm2, %v83_v8  ;;  %405 = vmatprep.subr.bf16.mxu0 %v519_v2 }
  0x5a   :  { %407 = vmatpush3.bf16.msra.mxu0 %v406_v14 }
 0x125   :  { %v158_v15 = vpop.f32.mrb[0].mxu1 }
 0x126   :  { %v380_v16 = vpop.f32.mrb[1].mxu1 }
 0x12a   :  { %v232_v17 = vpop.f32.mrb[2].mxu1 }
 0x12b   :  { %v233_v19 = vadd.f32 %v232_v17, %v158_v15  ;;  %v387_v20 = vpop.f32.mrb[3].mxu1 }
 0x12d   :  { %v243_v21 = vadd.f32 %v361_v18, %v233_v19 }
 0x12f   :  { %v244_v22 = vmax.f32 %v243_v21, 0.0 }
 0x131   :  { %397 = vmatmul.mubr.msk.f32.vlgmr.msra.gmra.mrb[0].mxu0 %vm256_vm3, %v244_v22 }
 0x204   :  { %v326_v24 = vpop.f32.mrb[0].mxu0 }
 0x205   :  { %v327_v25 = vadd.f32 %v362_v23, %v326_v24  ;;  %v398_v26 = vpop.f32.mrb[1].mxu0 }
 0x207   :  { %v330_v28 = vmax.f32 %v327_v25, 0.0 }
 0x209   :  { %v338_v29 = vmul.f32 %v364_v27, %v330_v28 }
 0x20b   :  { %v339_v30 = vsel %vm256_vm3, %v338_v29, 0.0 }
 0x20c   :  { %340 = vadd.xlane.f32.xlu0 %v339_v30 }
 0x299   :  { %v341_v32 = vpop.xlane.xlu0 %340 }
 0x29a   :  { %v349_v33 = vadd.f32 %v365_v31, %v341_v32 }
 0x29c   :  { %351 = vst.msk [vmem:[%s661_s9] sm:$0xff] %vm350_vm4, %v349_v33 }
 0x29d   :  { %356 = vsyncpa [#allocation4], 1 }
 0x29e   :  { %357 = vsyncpa [#allocation6], 1 }
 0x29f   :  { %358 = vsyncpa [#allocation9], 1 }

</bundles_post_ra>
